<compile_context>
chip_gen: v6e
topology: v6e:2x2x1
jax: 0.10.0
libtpu: 0.0.40
codegen_flags: <defaults>
</compile_context>

<pallas_src>
import jax
import jax.numpy as jnp
from jax.experimental import pallas as pl
from jax.experimental.pallas import tpu as pltpu


def _round_up(x, m):
    return (x + m - 1) // m * m


# ---------------------------------------------------------------------------
# Kernel: fused (value + actor) towers, lane-dense packed output [hidden | value | 0].
# ---------------------------------------------------------------------------
def _policy_kernel(x_ref, mean_ref, inv_std_ref,
                   w1_ref, b1_ref, w2_ref, b2_ref, w3_ref, b3_ref, w4_ref, b4_ref,
                   out_ref):
    mm_dtype = w1_ref.dtype  # matmul operand dtype (bf16 by default)

    x = x_ref[...]
    # ObsNorm (clip=5) with fixed stats; multiply by precomputed 1/std (no vector divide).
    obs = jnp.clip((x - mean_ref[...]) * inv_std_ref[...], -5.0, 5.0)

    # Layer 1: [B, in] @ [in, F1], columns = [value tower | actor tower | pad]
    h = jnp.dot(obs.astype(mm_dtype), w1_ref[...],
                preferred_element_type=jnp.float32) + b1_ref[...]
    h = jnp.tanh(h)

    # Layer 2: block-diagonal fused weight
    h = jnp.dot(h.astype(mm_dtype), w2_ref[...],
                preferred_element_type=jnp.float32) + b2_ref[...]
    h = jnp.tanh(h)

    # Layer 3: block-diagonal fused weight
    h = jnp.dot(h.astype(mm_dtype), w3_ref[...],
                preferred_element_type=jnp.float32) + b3_ref[...]
    h = jnp.tanh(h)

    # Layer 4: one lane-dense matmul that both computes the value head (v_fc4) and
    # passes the actor hidden through an identity block -> [hidden | value | zeros].
    out = jnp.dot(h.astype(mm_dtype), w4_ref[...],
                  preferred_element_type=jnp.float32) + b4_ref[...]
    out_ref[...] = out.astype(out_ref.dtype)


# ---------------------------------------------------------------------------
# Wrapper
# ---------------------------------------------------------------------------
def mlp_policy_forward(x, fused, *, block_b=512):
    """x: [B, num_inputs] f32.  fused: dict from fuse_params().
    Returns (value [B,1] f32, hidden [B,H3] f32)."""
    B, num_in = x.shape
    H3 = fused["H3"]
    F1 = fused["w1"].shape[1]
    F2 = fused["w2"].shape[1]
    F3 = fused["w3"].shape[1]
    Fo = fused["w4"].shape[1]

    # Batch tile: big enough to amortize per-step overhead, padded to sublane multiple.
    bt = block_b if B >= block_b else _round_up(max(B, 1), 8)
    B_pad = _round_up(B, bt)
    x_p = jnp.pad(x, ((0, B_pad - B), (0, 0))) if B_pad != B else x

    const = lambda i: (0, 0)  # weights/biases: same block every step -> VMEM-resident

    out = pl.pallas_call(
        _policy_kernel,
        out_shape=jax.ShapeDtypeStruct((B_pad, Fo), jnp.float32),
        grid=(B_pad // bt,),
        in_specs=[
            pl.BlockSpec((bt, num_in), lambda i: (i, 0)),   # x tile (pipelined over batch)
            pl.BlockSpec((1, num_in), const),               # obs mean
            pl.BlockSpec((1, num_in), const),               # obs 1/std
            pl.BlockSpec((num_in, F1), const),              # fused W1
            pl.BlockSpec((1, F1), const),                   # fused b1
            pl.BlockSpec((F1, F2), const),                  # fused W2 (block-diag)
            pl.BlockSpec((1, F2), const),
            pl.BlockSpec((F2, F3), const),                  # fused W3 (block-diag)
            pl.BlockSpec((1, F3), const),
            pl.BlockSpec((F3, Fo), const),                  # fused W4 (value col + identity)
            pl.BlockSpec((1, Fo), const),
        ],
        out_specs=pl.BlockSpec((bt, Fo), lambda i: (i, 0)),  # lane-dense packed output
        compiler_params=pltpu.CompilerParams(
            dimension_semantics=("parallel",)),              # megacore sharding on v7x
    )(x_p, fused["obs_mean"], fused["obs_inv_std"],
      fused["w1"], fused["b1"], fused["w2"], fused["b2"],
      fused["w3"], fused["b3"], fused["w4"], fused["b4"])

    hidden = out[:B, :H3]
    value = out[:B, H3:H3 + 1]
    return value, hidden


# ---------------------------------------------------------------------------
# Parameter construction (mimics weights_init_mlp) + fusion into kernel layout
# ---------------------------------------------------------------------------
def _init_linear(key, in_features, out_features):
    """W ~ N(0,1) row-normalized to unit L2 norm, bias = 0.
    Returns W transposed to [in, out] and bias [out]."""
    w = jax.random.normal(key, (out_features, in_features), dtype=jnp.float32)
    w = w / jnp.sqrt(jnp.sum(w * w, axis=1, keepdims=True))
    b = jnp.zeros((out_features,), dtype=jnp.float32)
    return w.T, b


def make_params(key, num_inputs, H1=64, H2=64, H3=64):
    keys = jax.random.split(key, 7)
    p = {}
    p["v_w1"], p["v_b1"] = _init_linear(keys[0], num_inputs, H1)
    p["v_w2"], p["v_b2"] = _init_linear(keys[1], H1, H2)
    p["v_w3"], p["v_b3"] = _init_linear(keys[2], H2, H3)
    p["v_w4"], p["v_b4"] = _init_linear(keys[3], H3, 1)
    p["a_w1"], p["a_b1"] = _init_linear(keys[4], num_inputs, H1)
    p["a_w2"], p["a_b2"] = _init_linear(keys[5], H1, H2)
    p["a_w3"], p["a_b3"] = _init_linear(keys[6], H2, H3)
    p["obs_mean"] = jnp.zeros((1, num_inputs), dtype=jnp.float32)
    p["obs_std"] = jnp.ones((1, num_inputs), dtype=jnp.float32)
    p["dims"] = (num_inputs, H1, H2, H3)
    return p


def fuse_params(p, matmul_dtype=jnp.bfloat16):
    """Builds lane-dense fused weights: value tower in lanes [0,H), actor in [H,2H)."""
    num_inputs, H1, H2, H3 = p["dims"]
    F1 = _round_up(2 * H1, 128)
    F2 = _round_up(2 * H2, 128)
    F3 = _round_up(2 * H3, 128)
    Fo = _round_up(H3 + 1, 128)

    # Layer 1: [in, F1] = [v_w1 | a_w1 | 0]
    w1 = jnp.zeros((num_inputs, F1), jnp.float32)
    w1 = w1.at[:, 0:H1].set(p["v_w1"]).at[:, H1:2 * H1].set(p["a_w1"])
    b1 = jnp.zeros((1, F1), jnp.float32)
    b1 = b1.at[0, 0:H1].set(p["v_b1"]).at[0, H1:2 * H1].set(p["a_b1"])

    # Layer 2: block-diagonal
    w2 = jnp.zeros((F1, F2), jnp.float32)
    w2 = w2.at[0:H1, 0:H2].set(p["v_w2"]).at[H1:2 * H1, H2:2 * H2].set(p["a_w2"])
    b2 = jnp.zeros((1, F2), jnp.float32)
    b2 = b2.at[0, 0:H2].set(p["v_b2"]).at[0, H2:2 * H2].set(p["a_b2"])

    # Layer 3: block-diagonal
    w3 = jnp.zeros((F2, F3), jnp.float32)
    w3 = w3.at[0:H2, 0:H3].set(p["v_w3"]).at[H2:2 * H2, H3:2 * H3].set(p["a_w3"])
    b3 = jnp.zeros((1, F3), jnp.float32)
    b3 = b3.at[0, 0:H3].set(p["v_b3"]).at[0, H3:2 * H3].set(p["a_b3"])

    # Layer 4: output lanes = [actor hidden (H3) | value (1) | zeros]
    w4 = jnp.zeros((F3, Fo), jnp.float32)
    w4 = w4.at[H3:2 * H3, 0:H3].set(jnp.eye(H3, dtype=jnp.float32))  # actor pass-through
    w4 = w4.at[0:H3, H3:H3 + 1].set(p["v_w4"])                        # value column (v_fc4)
    b4 = jnp.zeros((1, Fo), jnp.float32)
    b4 = b4.at[0, H3:H3 + 1].set(p["v_b4"])

    return {
        "obs_mean": p["obs_mean"],
        "obs_inv_std": 1.0 / p["obs_std"],
        "w1": w1.astype(matmul_dtype), "b1": b1,
        "w2": w2.astype(matmul_dtype), "b2": b2,
        "w3": w3.astype(matmul_dtype), "b3": b3,
        "w4": w4.astype(matmul_dtype), "b4": b4,
        "H3": H3,
    }


def _reference_forward(x, p):
    obs = jnp.clip((x - p["obs_mean"]) / p["obs_std"], -5.0, 5.0)
    v = jnp.tanh(obs @ p["v_w1"] + p["v_b1"])
    v = jnp.tanh(v @ p["v_w2"] + p["v_b2"])
    v = jnp.tanh(v @ p["v_w3"] + p["v_b3"])
    value = v @ p["v_w4"] + p["v_b4"]
    a = jnp.tanh(obs @ p["a_w1"] + p["a_b1"])
    a = jnp.tanh(a @ p["a_w2"] + p["a_b2"])
    a = jnp.tanh(a @ p["a_w3"] + p["a_b3"])
    return value, a


if __name__ == "__main__":
    key = jax.random.PRNGKey(0)
    k_in, k_params = jax.random.split(key)

    batch = 2
    num_inputs = 16
    H1 = H2 = H3 = 64

    x = jax.random.normal(k_in, (batch, num_inputs), dtype=jnp.float32)
    params = make_params(k_params, num_inputs, H1, H2, H3)
    fused = fuse_params(params, matmul_dtype=jnp.bfloat16)

    value, hidden = mlp_policy_forward(x, fused)
    value = jax.block_until_ready(value)
    hidden = jax.block_until_ready(hidden)

    # sanity-check against a pure-JAX f32 reference (bf16 MXU operands -> looser tol)
    value_ref, hidden_ref = _reference_forward(x, params)
    assert value.shape == (batch, 1) and hidden.shape == (batch, H3)
    assert jnp.allclose(value, value_ref, atol=3e-2, rtol=3e-2), \
        float(jnp.max(jnp.abs(value - value_ref)))
    assert jnp.allclose(hidden, hidden_ref, atol=3e-2, rtol=3e-2), \
        float(jnp.max(jnp.abs(hidden - hidden_ref)))

    print("KERNEL_OK")
</pallas_src>

<mosaic_0001>
module attributes {stable_mosaic.version = 11 : i64} {
  func.func @_policy_kernel(%arg0: i32, %arg1: memref<8x16xf32, #tpu.memory_space<vmem>>, %arg2: memref<1x16xf32, #tpu.memory_space<vmem>>, %arg3: memref<1x16xf32, #tpu.memory_space<vmem>>, %arg4: memref<16x128xbf16, #tpu.memory_space<vmem>>, %arg5: memref<1x128xf32, #tpu.memory_space<vmem>>, %arg6: memref<128x128xbf16, #tpu.memory_space<vmem>>, %arg7: memref<1x128xf32, #tpu.memory_space<vmem>>, %arg8: memref<128x128xbf16, #tpu.memory_space<vmem>>, %arg9: memref<1x128xf32, #tpu.memory_space<vmem>>, %arg10: memref<128x128xbf16, #tpu.memory_space<vmem>>, %arg11: memref<1x128xf32, #tpu.memory_space<vmem>>, %arg12: memref<8x128xf32, #tpu.memory_space<vmem>>) attributes {dimension_semantics = [#tpu.dimension_semantics<parallel>], iteration_bounds = array<i64: 1>, scalar_prefetch = 0 : i64, scratch_operands = 0 : i64, tpu.core_type = #tpu.core_type<tc>, window_params = [{transform_indices = @transform_0, window_bounds = array<i64: 8, 16>}, {pipeline_mode = #tpu.pipeline_mode<synchronous>, transform_indices = @transform_1, window_bounds = array<i64: 1, 16>}, {pipeline_mode = #tpu.pipeline_mode<synchronous>, transform_indices = @transform_2, window_bounds = array<i64: 1, 16>}, {pipeline_mode = #tpu.pipeline_mode<synchronous>, transform_indices = @transform_3, window_bounds = array<i64: 16, 128>}, {pipeline_mode = #tpu.pipeline_mode<synchronous>, transform_indices = @transform_4, window_bounds = array<i64: 1, 128>}, {pipeline_mode = #tpu.pipeline_mode<synchronous>, transform_indices = @transform_5, window_bounds = array<i64: 128, 128>}, {pipeline_mode = #tpu.pipeline_mode<synchronous>, transform_indices = @transform_6, window_bounds = array<i64: 1, 128>}, {pipeline_mode = #tpu.pipeline_mode<synchronous>, transform_indices = @transform_7, window_bounds = array<i64: 128, 128>}, {pipeline_mode = #tpu.pipeline_mode<synchronous>, transform_indices = @transform_8, window_bounds = array<i64: 1, 128>}, {pipeline_mode = #tpu.pipeline_mode<synchronous>, transform_indices = @transform_9, window_bounds = array<i64: 128, 128>}, {pipeline_mode = #tpu.pipeline_mode<synchronous>, transform_indices = @transform_10, window_bounds = array<i64: 1, 128>}, {transform_indices = @transform_11, window_bounds = array<i64: 8, 128>}]} {
    %c0 = arith.constant 0 : index
    %c0_0 = arith.constant 0 : index
    %0 = vector.load %arg1[%c0, %c0_0] : memref<8x16xf32, #tpu.memory_space<vmem>>, vector<8x16xf32>
    %c0_1 = arith.constant 0 : index
    %c0_2 = arith.constant 0 : index
    %1 = vector.load %arg2[%c0_1, %c0_2] : memref<1x16xf32, #tpu.memory_space<vmem>>, vector<1x16xf32>
    %2 = vector.broadcast %1 : vector<1x16xf32> to vector<8x16xf32>
    %3 = arith.subf %0, %2 : vector<8x16xf32>
    %c0_3 = arith.constant 0 : index
    %c0_4 = arith.constant 0 : index
    %4 = vector.load %arg3[%c0_3, %c0_4] : memref<1x16xf32, #tpu.memory_space<vmem>>, vector<1x16xf32>
    %5 = vector.broadcast %4 : vector<1x16xf32> to vector<8x16xf32>
    %6 = arith.mulf %3, %5 : vector<8x16xf32>
    %cst = arith.constant -5.000000e+00 : f32
    %cst_5 = arith.constant 5.000000e+00 : f32
    %7 = vector.broadcast %cst : f32 to vector<8x16xf32>
    %8 = arith.maximumf %7, %6 : vector<8x16xf32>
    %9 = vector.broadcast %cst_5 : f32 to vector<8x16xf32>
    %10 = arith.minimumf %9, %8 : vector<8x16xf32>
    %11 = arith.truncf %10 : vector<8x16xf32> to vector<8x16xbf16>
    %c0_6 = arith.constant 0 : index
    %c0_7 = arith.constant 0 : index
    %12 = vector.load %arg4[%c0_6, %c0_7] : memref<16x128xbf16, #tpu.memory_space<vmem>>, vector<16x128xbf16>
    %cst_8 = arith.constant dense<0.000000e+00> : vector<8x128xf32>
    %13 = tpu.matmul %11, %12, %cst_8 {dimension_numbers = #tpu.dot_dimension_numbers<[1], [0], [0], [1], [0, 0, 1, 1], [], []>} : vector<8x16xbf16>, vector<16x128xbf16>, vector<8x128xf32> -> vector<8x128xf32>
    %c0_9 = arith.constant 0 : index
    %c0_10 = arith.constant 0 : index
    %14 = vector.load %arg5[%c0_9, %c0_10] : memref<1x128xf32, #tpu.memory_space<vmem>>, vector<1x128xf32>
    %15 = vector.broadcast %14 : vector<1x128xf32> to vector<8x128xf32>
    %16 = arith.addf %13, %15 : vector<8x128xf32>
    %17 = math.tanh %16 : vector<8x128xf32>
    %18 = arith.truncf %17 : vector<8x128xf32> to vector<8x128xbf16>
    %c0_11 = arith.constant 0 : index
    %c0_12 = arith.constant 0 : index
    %19 = vector.load %arg6[%c0_11, %c0_12] : memref<128x128xbf16, #tpu.memory_space<vmem>>, vector<128x128xbf16>
    %cst_13 = arith.constant dense<0.000000e+00> : vector<8x128xf32>
    %20 = tpu.matmul %18, %19, %cst_13 {dimension_numbers = #tpu.dot_dimension_numbers<[1], [0], [0], [1], [0, 0, 1, 1], [], []>} : vector<8x128xbf16>, vector<128x128xbf16>, vector<8x128xf32> -> vector<8x128xf32>
    %c0_14 = arith.constant 0 : index
    %c0_15 = arith.constant 0 : index
    %21 = vector.load %arg7[%c0_14, %c0_15] : memref<1x128xf32, #tpu.memory_space<vmem>>, vector<1x128xf32>
    %22 = vector.broadcast %21 : vector<1x128xf32> to vector<8x128xf32>
    %23 = arith.addf %20, %22 : vector<8x128xf32>
    %24 = math.tanh %23 : vector<8x128xf32>
    %25 = arith.truncf %24 : vector<8x128xf32> to vector<8x128xbf16>
    %c0_16 = arith.constant 0 : index
    %c0_17 = arith.constant 0 : index
    %26 = vector.load %arg8[%c0_16, %c0_17] : memref<128x128xbf16, #tpu.memory_space<vmem>>, vector<128x128xbf16>
    %cst_18 = arith.constant dense<0.000000e+00> : vector<8x128xf32>
    %27 = tpu.matmul %25, %26, %cst_18 {dimension_numbers = #tpu.dot_dimension_numbers<[1], [0], [0], [1], [0, 0, 1, 1], [], []>} : vector<8x128xbf16>, vector<128x128xbf16>, vector<8x128xf32> -> vector<8x128xf32>
    %c0_19 = arith.constant 0 : index
    %c0_20 = arith.constant 0 : index
    %28 = vector.load %arg9[%c0_19, %c0_20] : memref<1x128xf32, #tpu.memory_space<vmem>>, vector<1x128xf32>
    %29 = vector.broadcast %28 : vector<1x128xf32> to vector<8x128xf32>
    %30 = arith.addf %27, %29 : vector<8x128xf32>
    %31 = math.tanh %30 : vector<8x128xf32>
    %32 = arith.truncf %31 : vector<8x128xf32> to vector<8x128xbf16>
    %c0_21 = arith.constant 0 : index
    %c0_22 = arith.constant 0 : index
    %33 = vector.load %arg10[%c0_21, %c0_22] : memref<128x128xbf16, #tpu.memory_space<vmem>>, vector<128x128xbf16>
    %cst_23 = arith.constant dense<0.000000e+00> : vector<8x128xf32>
    %34 = tpu.matmul %32, %33, %cst_23 {dimension_numbers = #tpu.dot_dimension_numbers<[1], [0], [0], [1], [0, 0, 1, 1], [], []>} : vector<8x128xbf16>, vector<128x128xbf16>, vector<8x128xf32> -> vector<8x128xf32>
    %c0_24 = arith.constant 0 : index
    %c0_25 = arith.constant 0 : index
    %35 = vector.load %arg11[%c0_24, %c0_25] : memref<1x128xf32, #tpu.memory_space<vmem>>, vector<1x128xf32>
    %36 = vector.broadcast %35 : vector<1x128xf32> to vector<8x128xf32>
    %37 = arith.addf %34, %36 : vector<8x128xf32>
    %c0_26 = arith.constant 0 : index
    %c0_27 = arith.constant 0 : index
    %38 = vector.load %arg12[%c0_26, %c0_27] : memref<8x128xf32, #tpu.memory_space<vmem>>, vector<8x128xf32>
    tpu.vector_store %arg12[%c0_26, %c0_27], %37 {strides = array<i32>} : memref<8x128xf32, #tpu.memory_space<vmem>>, vector<8x128xf32>,
    return
  }
  func.func @transform_0(%arg0: i32) -> (i32, i32) {
    %c0_i32 = arith.constant 0 : i32
    %c0_i32_0 = arith.constant 0 : i32
    return %arg0, %c0_i32 : i32, i32
  }
  func.func @transform_1(%arg0: i32) -> (i32, i32) {
    %c0_i32 = arith.constant 0 : i32
    %c0_i32_0 = arith.constant 0 : i32
    %c0_i32_1 = arith.constant 0 : i32
    return %c0_i32, %c0_i32_0 : i32, i32
  }
  func.func @transform_2(%arg0: i32) -> (i32, i32) {
    %c0_i32 = arith.constant 0 : i32
    %c0_i32_0 = arith.constant 0 : i32
    %c0_i32_1 = arith.constant 0 : i32
    return %c0_i32, %c0_i32_0 : i32, i32
  }
  func.func @transform_3(%arg0: i32) -> (i32, i32) {
    %c0_i32 = arith.constant 0 : i32
    %c0_i32_0 = arith.constant 0 : i32
    %c0_i32_1 = arith.constant 0 : i32
    return %c0_i32, %c0_i32_0 : i32, i32
  }
  func.func @transform_4(%arg0: i32) -> (i32, i32) {
    %c0_i32 = arith.constant 0 : i32
    %c0_i32_0 = arith.constant 0 : i32
    %c0_i32_1 = arith.constant 0 : i32
    return %c0_i32, %c0_i32_0 : i32, i32
  }
  func.func @transform_5(%arg0: i32) -> (i32, i32) {
    %c0_i32 = arith.constant 0 : i32
    %c0_i32_0 = arith.constant 0 : i32
    %c0_i32_1 = arith.constant 0 : i32
    return %c0_i32, %c0_i32_0 : i32, i32
  }
  func.func @transform_6(%arg0: i32) -> (i32, i32) {
    %c0_i32 = arith.constant 0 : i32
    %c0_i32_0 = arith.constant 0 : i32
    %c0_i32_1 = arith.constant 0 : i32
    return %c0_i32, %c0_i32_0 : i32, i32
  }
  func.func @transform_7(%arg0: i32) -> (i32, i32) {
    %c0_i32 = arith.constant 0 : i32
    %c0_i32_0 = arith.constant 0 : i32
    %c0_i32_1 = arith.constant 0 : i32
    return %c0_i32, %c0_i32_0 : i32, i32
  }
  func.func @transform_8(%arg0: i32) -> (i32, i32) {
    %c0_i32 = arith.constant 0 : i32
    %c0_i32_0 = arith.constant 0 : i32
    %c0_i32_1 = arith.constant 0 : i32
    return %c0_i32, %c0_i32_0 : i32, i32
  }
  func.func @transform_9(%arg0: i32) -> (i32, i32) {
    %c0_i32 = arith.constant 0 : i32
    %c0_i32_0 = arith.constant 0 : i32
    %c0_i32_1 = arith.constant 0 : i32
    return %c0_i32, %c0_i32_0 : i32, i32
  }
  func.func @transform_10(%arg0: i32) -> (i32, i32) {
    %c0_i32 = arith.constant 0 : i32
    %c0_i32_0 = arith.constant 0 : i32
    %c0_i32_1 = arith.constant 0 : i32
    return %c0_i32, %c0_i32_0 : i32, i32
  }
  func.func @transform_11(%arg0: i32) -> (i32, i32) {
    %c0_i32 = arith.constant 0 : i32
    %c0_i32_0 = arith.constant 0 : i32
    return %arg0, %c0_i32 : i32, i32
  }
}

</mosaic_0001>

<bundles_post_ra>
// kernel: tpu_custom_call.1
= control target key start
LH: loop header
LB: loop body
LE: loop exit
PB: predicated region body
PF: predicated region fallthrough
CT: control target
= control target key end

     0   :  { %16 = vsyncpa [#allocation3], 0  ;;  %s990_s0 = inlined_call_operand.hbm [shape: f32[8,16], index: 0, kind: input, shape index: {}]   ;;  %s991_s1 = inlined_call_operand.vmem [shape: f32[1,16], index: 1, kind: input, shape index: {}]   ;;  %s992_s2 = inlined_call_operand.vmem [shape: f32[1,16], index: 2, kind: input, shape index: {}]   ;;  %s993_s3 = inlined_call_operand.hbm [shape: bf16[16,128], index: 3, kind: input, shape index: {}]   ;;  %s994_s4 = inlined_call_operand.vmem [shape: f32[1,128], index: 4, kind: input, shape index: {}]   ;;  %s995_s5 = inlined_call_operand.hbm [shape: bf16[128,128], index: 5, kind: input, shape index: {}]   ;;  %s996_s6 = inlined_call_operand.vmem [shape: f32[1,128], index: 6, kind: input, shape index: {}]   ;;  %s997_s7 = inlined_call_operand.hbm [shape: bf16[128,128], index: 7, kind: input, shape index: {}]   ;;  %s998_s8 = inlined_call_operand.vmem [shape: f32[1,128], index: 8, kind: input, shape index: {}]   ;;  %s999_s9 = inlined_call_operand.hbm [shape: bf16[128,128], index: 9, kind: input, shape index: {}]   ;;  %s1000_s10 = inlined_call_operand.vmem [shape: f32[1,128], index: 10, kind: input, shape index: {}]   ;;  %s1001_s11 = inlined_call_operand.hbm [shape: f32[8,128], index: 11, kind: output, shape index: {}]  }
   0x1   :  { %17 = vsyncpa [#allocation6], 0 }
   0x2   :  { %18 = vsyncpa [#allocation9], 0 }
   0x3   :  { %19 = vsyncpa [#allocation4], 0  ;;  %s839_s17 = smov [#allocation5]  }
   0x4   :  { %s39_s18 = sshll.u32 %s839_s17, 4  ;;  %s40_s18 = int_to_ptr.vmem [resolvable:$true] %s39_s18 }
   0x5   :  { %s719_s19 = scalar_lea.vmem %s40_s18, 128  ;;  %p724_p1 = scmp.lt.s32.totalorder %s40_s18, %s40_s18 }
   0x6   :  { %p720_p0 = scmp.ne.s32.totalorder %s40_s18, %s719_s19  ;;  %p725_p2 = scmp.lt.s32.totalorder %s719_s19, %s719_s19 }
   0x8   :  { %p726_p3 = por %p725_p2, %p724_p1 }
   0xa   :  { %p727_p4 = pnand %p726_p3, %p720_p0 }
   0xc   :  { %730 = shalt.err (!%p727_p4)
}
   0xd   :  { %s840_s20 = smov 64   ;;  %s841_s21 = smov 4  }
   0xe   :  { %45 = dma.hbm_to_vmem [thread:$0]  %s993_s3, 128, %s40_s18, [#allocation6], %s840_s20, %s840_s20, %s841_s21  }
   0xf   :  { %s842_s24 = smov [#allocation8]   ;;  %s843_s26 = smov [#allocation2]  }
  0x10   :  { %s67_s25 = sshll.u32 %s842_s24, 4  ;;  %s26_s27 = sshll.u32 %s843_s26, 4  ;;  %s68_s25 = int_to_ptr.vmem [resolvable:$true] %s67_s25  ;;  %s27_s27 = int_to_ptr.vmem [resolvable:$true] %s26_s27 }
  0x11   :  { %s739_s28 = scalar_lea.vmem %s68_s25, 1024  ;;  %p744_p6 = scmp.lt.s32.totalorder %s68_s25, %s68_s25 }
  0x12   :  { %p740_p5 = scmp.ne.s32.totalorder %s68_s25, %s739_s28  ;;  %p745_p7 = scmp.lt.s32.totalorder %s739_s28, %s739_s28 }
  0x14   :  { %p746_p8 = por %p745_p7, %p744_p6 }
  0x16   :  { %p747_p9 = pnand %p746_p8, %p740_p5 }
  0x18   :  { %750 = shalt.err (!%p747_p9)
}
  0x19   :  { %73 = dma.hbm_to_vmem [thread:$0]  %s997_s7, 1024, %s68_s25, [#allocation9], %s840_s20, %s840_s20, %s841_s21  }
  0x1a   :  { %s759_s3 = scalar_lea.vmem %s27_s27, 128  ;;  %p764_p11 = scmp.lt.s32.totalorder %s27_s27, %s27_s27 }
  0x1b   :  { %p760_p10 = scmp.ne.s32.totalorder %s27_s27, %s759_s3  ;;  %p765_p12 = scmp.lt.s32.totalorder %s759_s3, %s759_s3 }
  0x1d   :  { %p766_p13 = por %p765_p12, %p764_p11 }
  0x1f   :  { %p767_p0 = pnand %p766_p13, %p760_p10 }
  0x21   :  { %770 = shalt.err (!%p767_p0)
}
  0x22   :  { %29 = dma.hbm_to_vmem [thread:$0]  %s990_s0, 128, %s27_s27, [#allocation3]  }
  0x23   :  { %s844_s14 = smov [#allocation7]   ;;  %s845_s16 = smov [#allocation10]  }
  0x24   :  { %s53_s15 = sshll.u32 %s844_s14, 4  ;;  %s81_s17 = sshll.u32 %s845_s16, 4  ;;  %s54_s15 = int_to_ptr.vmem [resolvable:$true] %s53_s15  ;;  %s82_s17 = int_to_ptr.vmem [resolvable:$true] %s81_s17 }
  0x25   :  { %s779_s18 = scalar_lea.vmem %s54_s15, 1024  ;;  %p784_p2 = scmp.lt.s32.totalorder %s54_s15, %s54_s15 }
  0x26   :  { %p780_p1 = scmp.ne.s32.totalorder %s54_s15, %s779_s18  ;;  %p785_p3 = scmp.lt.s32.totalorder %s779_s18, %s779_s18 }
  0x28   :  { %p786_p4 = por %p785_p3, %p784_p2 }
  0x2a   :  { %p787_p5 = pnand %p786_p4, %p780_p1 }
  0x2c   :  { %790 = shalt.err (!%p787_p5)
}
  0x2d   :  { %59 = dma.hbm_to_vmem [thread:$0]  %s995_s5, 1024, %s54_s15, [#allocation6], %s840_s20, %s840_s20, %s841_s21  }
  0x2e   :  { %s799_s0 = scalar_lea.vmem %s82_s17, 1024  ;;  %p804_p7 = scmp.lt.s32.totalorder %s82_s17, %s82_s17 }
  0x2f   :  { %p800_p6 = scmp.ne.s32.totalorder %s82_s17, %s799_s0  ;;  %p805_p8 = scmp.lt.s32.totalorder %s799_s0, %s799_s0 }
  0x31   :  { %p806_p9 = por %p805_p8, %p804_p7 }
  0x33   :  { %p807_p10 = pnand %p806_p9, %p800_p6 }
  0x35   :  { %810 = shalt.err (!%p807_p10)
}
  0x36   :  { %87 = dma.hbm_to_vmem [thread:$0]  %s999_s9, 1024, %s82_s17, [#allocation9], %s840_s20, %s840_s20, %s841_s21  }
  0x37   :  { %831 = dma.done.wait [#allocation3], 128  }
  0x38   :  { %832 = vsyncadd [#allocation3], 4294967168 }
  0x39   :  { %833 = dma.done.wait [#allocation6], 1152  }
  0x3a   :  { %834 = vsyncadd [#allocation6], 4294966144 }
  0x3b   :  { %835 = dma.done.wait [#allocation9], 2048  }
  0x3c   :  { %836 = vsyncadd [#allocation9], 4294965248  ;;  %v846_v0 = vmov 0.0   ;;  %vm847_vm0 = vmmov 0   ;;  %v680_v1 = vld [vmem:[#allocation5] sm:$0xff]   ;;  %v106_v2 = vld [vmem:[#allocation2] sm:$0xff] }
  0x3d   :  { %604 = vmatprep.subr.bf16.mxu0 %v846_v0  ;;  %606 = vmatprep.mubr.msk.bf16.mxu0 %vm847_vm0, %v846_v0  ;;  %v542_v3 = vld [vmem:[%s991_s1] ss:$0 sm:$0xff]  ;;  %v681_v6 = vld [vmem:[#allocation7 + $0x38] sm:$0xff]   ;;  %vm141_vm1 = vcmask 130048   ;;  %v683_v10 = vld [vmem:[#allocation7 + $0x28] sm:$0xff]   ;;  %s848_s28 = smov [#allocation11]  }
  0x3e   :  { %610 = vmatprep.subr.bf16.mxu1 %v846_v0  ;;  %626 = vmatprep.mubr.msk.bf16.mxu1 %vm847_vm0, %v846_v0  ;;  %v543_v4 = vld [vmem:[%s992_s2] ss:$0 sm:$0xff]  ;;  %v114_v5 = vsub.f32 %v106_v2, %v542_v3  ;;  %v684_v12 = vld [vmem:[#allocation7 + $0x20] sm:$0xff]   ;;  %v685_v13 = vld [vmem:[#allocation7 + $0x18] sm:$0xff]   ;;  %s531_s29 = sshll.u32 %s848_s28, 4  ;;  %s532_s29 = int_to_ptr.vmem [resolvable:$true] %s531_s29 }
  0x3f   :  { %605 = vmatpush3.bf16.msra.mxu0 %v680_v1  ;;  %611 = vmatpush3.bf16.msra.mxu1 %v681_v6  ;;  %v682_v8 = vld [vmem:[#allocation7 + $0x30] sm:$0xff]   ;;  %v687_v15 = vld [vmem:[#allocation7 + $0x8] sm:$0xff]   ;;  %v688_v16 = vld [vmem:[#allocation7] sm:$0xff]   ;;  %p816_p12 = scmp.lt.s32.totalorder %s532_s29, %s532_s29 }
  0x40   :  { %630 = vmatprep.subr.bf16.mxu0 %v846_v0  ;;  %v122_v7 = vmul.f32 %v543_v4, %v114_v5  ;;  %612 = vmatprep.subr.bf16.mxu1 %v846_v0  ;;  %v686_v14 = vld [vmem:[#allocation7 + $0x10] sm:$0xff]   ;;  %v689_v17 = vld [vmem:[#allocation8 + $0x38] sm:$0xff]   ;;  %v691_v19 = vld [vmem:[#allocation8 + $0x28] sm:$0xff]  }
  0x41   :  { %v690_v18 = vld [vmem:[#allocation8 + $0x30] sm:$0xff]   ;;  %v692_v28 = vld [vmem:[#allocation8 + $0x20] sm:$0xff]   ;;  %v693_v29 = vld [vmem:[#allocation8 + $0x18] sm:$0xff]  }
  0x42   :  { %v544_v9 = vclamps-f32 %v122_v7, 5.0  ;;  %v545_v20 = vld [vmem:[%s994_s4] ss:$0 sm:$0xff]  ;;  %v695_v31 = vld [vmem:[#allocation8 + $0x8] sm:$0xff]   ;;  %v696_v32 = vld [vmem:[#allocation8] sm:$0xff]  }
  0x43   :  { %613 = vmatpush3.bf16.msra.mxu1 %v682_v8  ;;  %v694_v30 = vld [vmem:[#allocation8 + $0x10] sm:$0xff]   ;;  %v697_v33 = vld [vmem:[#allocation10 + $0x38] sm:$0xff]   ;;  %v699_v35 = vld [vmem:[#allocation10 + $0x28] sm:$0xff]  }
  0x44   :  { %v125_v11 = vpack.c.bf16 %v544_v9, %v544_v9  ;;  %614 = vmatprep.subr.bf16.mxu1 %v846_v0  ;;  %v698_v34 = vld [vmem:[#allocation10 + $0x30] sm:$0xff]   ;;  %v700_v44 = vld [vmem:[#allocation10 + $0x20] sm:$0xff]   ;;  %v701_v45 = vld [vmem:[#allocation10 + $0x18] sm:$0xff]  }
  0x45   :  { %v548_v36 = vld [vmem:[%s996_s6] ss:$0 sm:$0xff]  ;;  %v703_v47 = vld [vmem:[#allocation10 + $0x8] sm:$0xff]   ;;  %v704_v48 = vld [vmem:[#allocation10] sm:$0xff]  }
  0x46   :  { %607 = vmatmul.mubr.msk.bf16.vlgmr.msra.gmra.mxu0 %vm141_vm1, %v125_v11  ;;  %v702_v46 = vld [vmem:[#allocation10 + $0x10] sm:$0xff]  }
  0x47   :  { %646 = vmatprep.mubr.msk.bf16.mxu0 %vm847_vm0, %v846_v0  ;;  %615 = vmatpush3.bf16.msra.mxu1 %v683_v10  ;;  %v557_v49 = vld [vmem:[%s998_s8] ss:$0 sm:$0xff]  ;;  %s811_s8 = scalar_lea.vmem %s532_s29, 128 }
  0x48   :  { %616 = vmatprep.subr.bf16.mxu1 %v846_v0  ;;  %631 = vmatpush3.bf16.msra.mxu0 %v689_v17  ;;  %v566_v57 = vld [vmem:[%s1000_s10] ss:$0 sm:$0xff]  ;;  %p812_p11 = scmp.ne.s32.totalorder %s532_s29, %s811_s8  ;;  %p817_p13 = scmp.lt.s32.totalorder %s811_s8, %s811_s8 }
  0x49   :  { %632 = vmatprep.subr.bf16.mxu0 %v846_v0 }
  0x4a   :  { %p818_p0 = por %p817_p13, %p816_p12 }
  0x4b   :  { %617 = vmatpush3.bf16.msra.mxu1 %v684_v12 }
  0x4c   :  { %618 = vmatprep.subr.bf16.mxu1 %v846_v0  ;;  %633 = vmatpush3.bf16.msra.mxu0 %v690_v18  ;;  %p819_p1 = pnand %p818_p0, %p812_p11 }
  0x4d   :  { %634 = vmatprep.subr.bf16.mxu0 %v846_v0 }
  0x4f   :  { %619 = vmatpush3.bf16.msra.mxu1 %v685_v13 }
  0x50   :  { %620 = vmatprep.subr.bf16.mxu1 %v846_v0  ;;  %635 = vmatpush3.bf16.msra.mxu0 %v691_v19 }
  0x51   :  { %636 = vmatprep.subr.bf16.mxu0 %v846_v0 }
  0x53   :  { %621 = vmatpush3.bf16.msra.mxu1 %v686_v14 }
  0x54   :  { %622 = vmatprep.subr.bf16.mxu1 %v846_v0  ;;  %637 = vmatpush3.bf16.msra.mxu0 %v692_v28 }
  0x55   :  { %638 = vmatprep.subr.bf16.mxu0 %v846_v0 }
  0x57   :  { %623 = vmatpush3.bf16.msra.mxu1 %v687_v15 }
  0x58   :  { %624 = vmatprep.subr.bf16.mxu1 %v846_v0  ;;  %639 = vmatpush3.bf16.msra.mxu0 %v693_v29 }
  0x59   :  { %640 = vmatprep.subr.bf16.mxu0 %v846_v0 }
  0x5b   :  { %625 = vmatpush3.bf16.msra.mxu1 %v688_v16 }
  0x5c   :  { %650 = vmatprep.subr.bf16.mxu1 %v846_v0  ;;  %641 = vmatpush3.bf16.msra.mxu0 %v694_v30 }
  0x5d   :  { %642 = vmatprep.subr.bf16.mxu0 %v846_v0 }
  0x60   :  { %643 = vmatpush3.bf16.msra.mxu0 %v695_v31 }
  0x61   :  { %644 = vmatprep.subr.bf16.mxu0 %v846_v0 }
  0x64   :  { %645 = vmatpush3.bf16.msra.mxu0 %v696_v32 }
 0x106   :  { %v179_v21 = vpop.f32.mrf.mxu0 }
 0x107   :  { %v180_v22 = vadd.f32 %v545_v20, %v179_v21 }
 0x108   :  { %v608_v23 = vpop.f32.mrf.mxu0 }
 0x109   :  { %705 = vtanh.f32 %v180_v22 }
 0x10a   :  { %v182_v24 = vpop.f32.mrf.mxu0 }
 0x10c   :  { %v609_v25 = vpop.f32.mrf.mxu0 }
 0x116   :  { %v706_v26 = vpop.eup %705 }
 0x117   :  { %v186_v27 = vpack.c.bf16 %v706_v26, %v706_v26 }
 0x119   :  { %627 = vmatmul.mubr.bf16.vlgmr.msra.gmra.mxu1 %v186_v27 }
 0x11a   :  { %666 = vmatprep.mubr.msk.bf16.mxu1 %vm847_vm0, %v846_v0  ;;  %651 = vmatpush3.bf16.msra.mxu1 %v697_v33 }
 0x11b   :  { %652 = vmatprep.subr.bf16.mxu1 %v846_v0 }
 0x11e   :  { %653 = vmatpush3.bf16.msra.mxu1 %v698_v34 }
 0x11f   :  { %654 = vmatprep.subr.bf16.mxu1 %v846_v0 }
 0x122   :  { %655 = vmatpush3.bf16.msra.mxu1 %v699_v35 }
 0x123   :  { %656 = vmatprep.subr.bf16.mxu1 %v846_v0 }
 0x126   :  { %657 = vmatpush3.bf16.msra.mxu1 %v700_v44 }
 0x127   :  { %658 = vmatprep.subr.bf16.mxu1 %v846_v0 }
 0x12a   :  { %659 = vmatpush3.bf16.msra.mxu1 %v701_v45 }
 0x12b   :  { %660 = vmatprep.subr.bf16.mxu1 %v846_v0 }
 0x12e   :  { %661 = vmatpush3.bf16.msra.mxu1 %v702_v46 }
 0x12f   :  { %662 = vmatprep.subr.bf16.mxu1 %v846_v0 }
 0x132   :  { %663 = vmatpush3.bf16.msra.mxu1 %v703_v47 }
 0x133   :  { %664 = vmatprep.subr.bf16.mxu1 %v846_v0 }
 0x136   :  { %665 = vmatpush3.bf16.msra.mxu1 %v704_v48 }
 0x1d9   :  { %v292_v37 = vpop.f32.mrf.mxu1 }
 0x1da   :  { %v293_v38 = vadd.f32 %v548_v36, %v292_v37 }
 0x1db   :  { %v628_v39 = vpop.f32.mrf.mxu1 }
 0x1dc   :  { %707 = vtanh.f32 %v293_v38 }
 0x1dd   :  { %v295_v40 = vpop.f32.mrf.mxu1 }
 0x1df   :  { %v629_v41 = vpop.f32.mrf.mxu1 }
 0x1e9   :  { %v708_v42 = vpop.eup %707 }
 0x1ea   :  { %v299_v43 = vpack.c.bf16 %v708_v42, %v708_v42 }
 0x1ec   :  { %647 = vmatmul.mubr.bf16.vlgmr.msra.gmra.mxu0 %v299_v43 }
 0x2ac   :  { %v405_v50 = vpop.f32.mrf.mxu0 }
 0x2ad   :  { %v406_v51 = vadd.f32 %v557_v49, %v405_v50 }
 0x2ae   :  { %v648_v52 = vpop.f32.mrf.mxu0 }
 0x2af   :  { %709 = vtanh.f32 %v406_v51 }
 0x2b0   :  { %v408_v53 = vpop.f32.mrf.mxu0 }
 0x2b2   :  { %v649_v54 = vpop.f32.mrf.mxu0 }
 0x2bc   :  { %v710_v55 = vpop.eup %709 }
 0x2bd   :  { %v412_v56 = vpack.c.bf16 %v710_v55, %v710_v55 }
 0x2bf   :  { %667 = vmatmul.mubr.bf16.vlgmr.msra.gmra.mxu1 %v412_v56 }
 0x37f   :  { %v518_v58 = vpop.f32.mrf.mxu1 }
 0x380   :  { %v519_v59 = vadd.f32 %v566_v57, %v518_v58 }
 0x381   :  { %v668_v60 = vpop.f32.mrf.mxu1 }
 0x382   :  { %524 = vst [vmem:[#allocation11] sm:$0xff] %v519_v59 }
 0x383   :  { %v521_v61 = vpop.f32.mrf.mxu1 }
 0x384   :  { %822 = shalt.err (!%p819_p1)
}
 0x385   :  { %534 = dma.vmem_to_hbm [thread:$0]  %s532_s29, 128, %s1001_s11, [#allocation4]   ;;  %v669_v62 = vpop.f32.mrf.mxu1 }
 0x386   :  { %837 = dma.done.wait [#allocation4], 128  }
 0x387   :  { %838 = vsyncadd [#allocation4], 4294967168 }
 0x388   :  { %538 = vsyncpa [#allocation3], 1 }
 0x389   :  { %539 = vsyncpa [#allocation6], 1 }
 0x38a   :  { %540 = vsyncpa [#allocation9], 1 }
 0x38b   :  { %541 = vsyncpa [#allocation4], 1 }

</bundles_post_ra>
